<compile_context>
chip_gen: v6e
topology: v6e:2x2x1
jax: 0.10.0
libtpu: 0.0.40
codegen_flags: <defaults>
</compile_context>

<pallas_src>
import functools

import jax
import jax.numpy as jnp
from jax.experimental import pallas as pl
from jax.experimental.pallas import tpu as pltpu

LANE = 128
SUBLANE_BF16 = 16  # bf16 activation tiles need sublane multiples of 16


def mlp_kernel(x_ref, w_ref, b_ref, o_ref):
    """Fused 4-layer MLP.

    x_ref: (TB, P) bf16, w_ref: (L, P, P) bf16, b_ref: (L, 1, P) f32,
    o_ref: (TB, P) f32.  bf16 MXU matmuls with f32 accumulate; bias + relu
    stay f32 on the VPU.
    """
    n_layers = w_ref.shape[0]

    def layer(h_bf16, l):
        acc = jnp.dot(h_bf16, w_ref[l], preferred_element_type=jnp.float32)
        return jnp.maximum(acc + b_ref[l], 0.0)        # bias add + relu in f32

    h = x_ref[...]                                      # (TB, P) bf16
    for l in range(n_layers - 1):
        h = layer(h, l).astype(jnp.bfloat16)            # back to bf16 for next MXU pass
    o_ref[...] = layer(h, n_layers - 1)                 # relu on output layer too


def _round_up(n, m):
    return ((n + m - 1) // m) * m


def prepare_params(params, input_size):
    """One-time parameter prep (do NOT call per forward).

    params: list of 4 (w, b) with w (in, out) f32 (already transposed vs.
    PyTorch's (out, in)) and b (1, out) f32.
    Returns (w_stack (L,P,P) bf16, b_stack (L,1,P) f32, P)."""
    dims = [input_size] + [w.shape[1] for (w, _) in params]
    p = _round_up(max(dims), LANE)                      # common lane-dense square
    ws, bs = [], []
    for w, b in params:
        wp = jnp.zeros((p, p), jnp.bfloat16).at[:w.shape[0], :w.shape[1]].set(
            w.astype(jnp.bfloat16))
        bp = jnp.zeros((1, p), jnp.float32).at[:, :b.shape[1]].set(
            b.astype(jnp.float32))
        ws.append(wp)
        bs.append(bp)
    w_stack = jnp.stack(ws)                             # (L, P, P) bf16
    b_stack = jnp.stack(bs)                             # (L, 1, P) f32
    return w_stack, b_stack, p


@functools.partial(jax.jit, static_argnames=("out_size", "tb"))
def alt_three_hidden_layer_mlp(x, w_stack, b_stack, *, out_size, tb=1024):
    """x: (B, input_size) f32.  w_stack/b_stack from prepare_params()."""
    batch, in_size = x.shape
    n_layers, p, _ = w_stack.shape

    # Batch tiling (bf16 activations -> 16-row granularity).
    bp = _round_up(batch, SUBLANE_BF16)
    if bp > tb:
        tb_eff = tb
    elif bp >= 2 * SUBLANE_BF16:
        # Keep >= 2 grid steps so dimension_semantics=("parallel",) can shard
        # the batch axis across both v7x TensorCores.
        tb_eff = _round_up((bp + 1) // 2, SUBLANE_BF16)
    else:
        tb_eff = bp
    bp = _round_up(bp, tb_eff)
    grid = (bp // tb_eff,)

    # Input prep (the only per-call data movement): pad + cast, fused by jit.
    xp = jnp.zeros((bp, p), jnp.bfloat16).at[:batch, :in_size].set(
        x.astype(jnp.bfloat16))

    # Activation tiles move with the grid; stacked weights/biases stay
    # VMEM-resident (constant index maps).
    x_spec = pl.BlockSpec((tb_eff, p), lambda i: (i, 0))
    o_spec = pl.BlockSpec((tb_eff, p), lambda i: (i, 0))
    w_spec = pl.BlockSpec((n_layers, p, p), lambda i: (0, 0, 0))
    b_spec = pl.BlockSpec((n_layers, 1, p), lambda i: (0, 0, 0))

    out_padded = pl.pallas_call(
        mlp_kernel,
        out_shape=jax.ShapeDtypeStruct((bp, p), jnp.float32),
        grid=grid,
        in_specs=[x_spec, w_spec, b_spec],
        out_specs=o_spec,
        compiler_params=pltpu.CompilerParams(
            dimension_semantics=("parallel",)),
    )(xp, w_stack, b_stack)

    return out_padded[:batch, :out_size]


def init_linear(key, in_features, out_features):
    """Deterministic init mirroring nn.Linear's U(-1/sqrt(in), 1/sqrt(in)).

    Returns weight already transposed to (in, out) plus bias (1, out)."""
    kw, kb = jax.random.split(key)
    bound = 1.0 / jnp.sqrt(jnp.float32(in_features))
    w = jax.random.uniform(kw, (in_features, out_features), jnp.float32, -bound, bound)
    b = jax.random.uniform(kb, (1, out_features), jnp.float32, -bound, bound)
    return w, b


if __name__ == "__main__":
    # Small shapes consistent with the assignment: tabular features (2 columns
    # deleted), three hidden layers of width 100, a few output classes.
    batch = 8
    input_size = 12
    hidden_layer_sizes = [100, 100, 100, 100]
    output_size = 3

    key = jax.random.PRNGKey(0)
    kx, k1, k2, k3, k4 = jax.random.split(key, 5)

    x = jax.random.normal(kx, (batch, input_size), jnp.float32)  # "scaled" features
    layer_dims = [input_size, hidden_layer_sizes[0], hidden_layer_sizes[1],
                  hidden_layer_sizes[2], output_size]
    keys = [k1, k2, k3, k4]
    params = [init_linear(keys[i], layer_dims[i], layer_dims[i + 1])
              for i in range(4)]

    # One-time parameter padding / casting / stacking (hoisted out of the
    # per-call path).
    w_stack, b_stack, _ = prepare_params(params, input_size)
    w_stack = jax.block_until_ready(w_stack)
    b_stack = jax.block_until_ready(b_stack)

    out = alt_three_hidden_layer_mlp(x, w_stack, b_stack, out_size=output_size)
    out = jax.block_until_ready(out)
    assert out.shape == (batch, output_size)

    # Reference 1: same bf16-operand / f32-accumulate path in pure JAX (tight).
    h = x
    for w, b in params:
        h = jnp.maximum(
            jnp.dot(h.astype(jnp.bfloat16), w.astype(jnp.bfloat16),
                    preferred_element_type=jnp.float32) + b, 0.0)
    assert jnp.allclose(out, h, atol=1e-2, rtol=1e-2)

    # Reference 2: full-f32 PyTorch-equivalent forward (loose, bf16 operands).
    h32 = x
    for w, b in params:
        h32 = jnp.maximum(h32 @ w + b, 0.0)
    assert jnp.allclose(out, h32, atol=5e-2, rtol=5e-2)

    print("KERNEL_OK")
</pallas_src>

<mosaic_0001>
module attributes {stable_mosaic.version = 11 : i64} {
  func.func @mlp_kernel(%arg0: i32, %arg1: memref<16x128xbf16, #tpu.memory_space<vmem>>, %arg2: memref<4x128x128xbf16, #tpu.memory_space<vmem>>, %arg3: memref<4x1x128xf32, #tpu.memory_space<vmem>>, %arg4: memref<16x128xf32, #tpu.memory_space<vmem>>) attributes {dimension_semantics = [#tpu.dimension_semantics<parallel>], iteration_bounds = array<i64: 1>, scalar_prefetch = 0 : i64, scratch_operands = 0 : i64, tpu.core_type = #tpu.core_type<tc>, window_params = [{transform_indices = @transform_0, window_bounds = array<i64: 16, 128>}, {pipeline_mode = #tpu.pipeline_mode<synchronous>, transform_indices = @transform_1, window_bounds = array<i64: 4, 128, 128>}, {pipeline_mode = #tpu.pipeline_mode<synchronous>, transform_indices = @transform_2, window_bounds = array<i64: 4, 1, 128>}, {transform_indices = @transform_3, window_bounds = array<i64: 16, 128>}]} {
    %c0 = arith.constant 0 : index
    %c0_0 = arith.constant 0 : index
    %0 = vector.load %arg1[%c0, %c0_0] : memref<16x128xbf16, #tpu.memory_space<vmem>>, vector<16x128xbf16>
    %c0_1 = arith.constant 0 : index
    %c0_2 = arith.constant 0 : index
    %c0_3 = arith.constant 0 : index
    %1 = vector.load %arg2[%c0_1, %c0_2, %c0_3] : memref<4x128x128xbf16, #tpu.memory_space<vmem>>, vector<1x128x128xbf16>
    %2 = vector.shape_cast %1 : vector<1x128x128xbf16> to vector<128x128xbf16>
    %cst = arith.constant dense<0.000000e+00> : vector<16x128xf32>
    %3 = tpu.matmul %0, %2, %cst {dimension_numbers = #tpu.dot_dimension_numbers<[1], [0], [0], [1], [0, 0, 1, 1], [], []>} : vector<16x128xbf16>, vector<128x128xbf16>, vector<16x128xf32> -> vector<16x128xf32>
    %c0_4 = arith.constant 0 : index
    %c0_5 = arith.constant 0 : index
    %c0_6 = arith.constant 0 : index
    %4 = vector.load %arg3[%c0_4, %c0_5, %c0_6] : memref<4x1x128xf32, #tpu.memory_space<vmem>>, vector<1x1x128xf32>
    %5 = vector.shape_cast %4 : vector<1x1x128xf32> to vector<1x128xf32>
    %6 = vector.broadcast %5 : vector<1x128xf32> to vector<16x128xf32>
    %7 = arith.addf %3, %6 : vector<16x128xf32>
    %cst_7 = arith.constant 0.000000e+00 : f32
    %8 = vector.broadcast %cst_7 : f32 to vector<16x128xf32>
    %9 = arith.maximumf %7, %8 : vector<16x128xf32>
    %10 = arith.truncf %9 : vector<16x128xf32> to vector<16x128xbf16>
    %c1 = arith.constant 1 : index
    %c0_8 = arith.constant 0 : index
    %c0_9 = arith.constant 0 : index
    %11 = vector.load %arg2[%c1, %c0_8, %c0_9] : memref<4x128x128xbf16, #tpu.memory_space<vmem>>, vector<1x128x128xbf16>
    %12 = vector.shape_cast %11 : vector<1x128x128xbf16> to vector<128x128xbf16>
    %cst_10 = arith.constant dense<0.000000e+00> : vector<16x128xf32>
    %13 = tpu.matmul %10, %12, %cst_10 {dimension_numbers = #tpu.dot_dimension_numbers<[1], [0], [0], [1], [0, 0, 1, 1], [], []>} : vector<16x128xbf16>, vector<128x128xbf16>, vector<16x128xf32> -> vector<16x128xf32>
    %c1_11 = arith.constant 1 : index
    %c0_12 = arith.constant 0 : index
    %c0_13 = arith.constant 0 : index
    %14 = vector.load %arg3[%c1_11, %c0_12, %c0_13] : memref<4x1x128xf32, #tpu.memory_space<vmem>>, vector<1x1x128xf32>
    %15 = vector.shape_cast %14 : vector<1x1x128xf32> to vector<1x128xf32>
    %16 = vector.broadcast %15 : vector<1x128xf32> to vector<16x128xf32>
    %17 = arith.addf %13, %16 : vector<16x128xf32>
    %cst_14 = arith.constant 0.000000e+00 : f32
    %18 = vector.broadcast %cst_14 : f32 to vector<16x128xf32>
    %19 = arith.maximumf %17, %18 : vector<16x128xf32>
    %20 = arith.truncf %19 : vector<16x128xf32> to vector<16x128xbf16>
    %c2 = arith.constant 2 : index
    %c0_15 = arith.constant 0 : index
    %c0_16 = arith.constant 0 : index
    %21 = vector.load %arg2[%c2, %c0_15, %c0_16] : memref<4x128x128xbf16, #tpu.memory_space<vmem>>, vector<1x128x128xbf16>
    %22 = vector.shape_cast %21 : vector<1x128x128xbf16> to vector<128x128xbf16>
    %cst_17 = arith.constant dense<0.000000e+00> : vector<16x128xf32>
    %23 = tpu.matmul %20, %22, %cst_17 {dimension_numbers = #tpu.dot_dimension_numbers<[1], [0], [0], [1], [0, 0, 1, 1], [], []>} : vector<16x128xbf16>, vector<128x128xbf16>, vector<16x128xf32> -> vector<16x128xf32>
    %c2_18 = arith.constant 2 : index
    %c0_19 = arith.constant 0 : index
    %c0_20 = arith.constant 0 : index
    %24 = vector.load %arg3[%c2_18, %c0_19, %c0_20] : memref<4x1x128xf32, #tpu.memory_space<vmem>>, vector<1x1x128xf32>
    %25 = vector.shape_cast %24 : vector<1x1x128xf32> to vector<1x128xf32>
    %26 = vector.broadcast %25 : vector<1x128xf32> to vector<16x128xf32>
    %27 = arith.addf %23, %26 : vector<16x128xf32>
    %cst_21 = arith.constant 0.000000e+00 : f32
    %28 = vector.broadcast %cst_21 : f32 to vector<16x128xf32>
    %29 = arith.maximumf %27, %28 : vector<16x128xf32>
    %30 = arith.truncf %29 : vector<16x128xf32> to vector<16x128xbf16>
    %c3 = arith.constant 3 : index
    %c0_22 = arith.constant 0 : index
    %c0_23 = arith.constant 0 : index
    %31 = vector.load %arg2[%c3, %c0_22, %c0_23] : memref<4x128x128xbf16, #tpu.memory_space<vmem>>, vector<1x128x128xbf16>
    %32 = vector.shape_cast %31 : vector<1x128x128xbf16> to vector<128x128xbf16>
    %cst_24 = arith.constant dense<0.000000e+00> : vector<16x128xf32>
    %33 = tpu.matmul %30, %32, %cst_24 {dimension_numbers = #tpu.dot_dimension_numbers<[1], [0], [0], [1], [0, 0, 1, 1], [], []>} : vector<16x128xbf16>, vector<128x128xbf16>, vector<16x128xf32> -> vector<16x128xf32>
    %c3_25 = arith.constant 3 : index
    %c0_26 = arith.constant 0 : index
    %c0_27 = arith.constant 0 : index
    %34 = vector.load %arg3[%c3_25, %c0_26, %c0_27] : memref<4x1x128xf32, #tpu.memory_space<vmem>>, vector<1x1x128xf32>
    %35 = vector.shape_cast %34 : vector<1x1x128xf32> to vector<1x128xf32>
    %36 = vector.broadcast %35 : vector<1x128xf32> to vector<16x128xf32>
    %37 = arith.addf %33, %36 : vector<16x128xf32>
    %cst_28 = arith.constant 0.000000e+00 : f32
    %38 = vector.broadcast %cst_28 : f32 to vector<16x128xf32>
    %39 = arith.maximumf %37, %38 : vector<16x128xf32>
    %c0_29 = arith.constant 0 : index
    %c0_30 = arith.constant 0 : index
    %40 = vector.load %arg4[%c0_29, %c0_30] : memref<16x128xf32, #tpu.memory_space<vmem>>, vector<16x128xf32>
    tpu.vector_store %arg4[%c0_29, %c0_30], %39 {strides = array<i32>} : memref<16x128xf32, #tpu.memory_space<vmem>>, vector<16x128xf32>,
    return
  }
  func.func @transform_0(%arg0: i32) -> (i32, i32) {
    %c0_i32 = arith.constant 0 : i32
    %c0_i32_0 = arith.constant 0 : i32
    return %arg0, %c0_i32 : i32, i32
  }
  func.func @transform_1(%arg0: i32) -> (i32, i32, i32) {
    %c0_i32 = arith.constant 0 : i32
    %c0_i32_0 = arith.constant 0 : i32
    %c0_i32_1 = arith.constant 0 : i32
    %c0_i32_2 = arith.constant 0 : i32
    return %c0_i32, %c0_i32_0, %c0_i32_1 : i32, i32, i32
  }
  func.func @transform_2(%arg0: i32) -> (i32, i32, i32) {
    %c0_i32 = arith.constant 0 : i32
    %c0_i32_0 = arith.constant 0 : i32
    %c0_i32_1 = arith.constant 0 : i32
    %c0_i32_2 = arith.constant 0 : i32
    return %c0_i32, %c0_i32_0, %c0_i32_1 : i32, i32, i32
  }
  func.func @transform_3(%arg0: i32) -> (i32, i32) {
    %c0_i32 = arith.constant 0 : i32
    %c0_i32_0 = arith.constant 0 : i32
    return %arg0, %c0_i32 : i32, i32
  }
}

</mosaic_0001>

<bundles_post_ra>
// kernel: alt_three_hidden_layer_mlp.1
= control target key start
LH: loop header
LB: loop body
LE: loop exit
PB: predicated region body
PF: predicated region fallthrough
CT: control target
= control target key end

     0   :  { %8 = vsyncpa [#allocation3], 0  ;;  %s725_s12 = smov [#allocation2]   ;;  %s814_s0 = inlined_call_operand.vmem [shape: bf16[16,128], index: 0, kind: input, shape index: {}]   ;;  %s815_s1 = inlined_call_operand.hbm [shape: bf16[4,128,128], index: 1, kind: input, shape index: {}]   ;;  %s816_s2 = inlined_call_operand.vmem [shape: f32[4,1,128], index: 2, kind: input, shape index: {}]   ;;  %s817_s3 = inlined_call_operand.vmem [shape: f32[16,128], index: 3, kind: output, shape index: {}]  }
   0x1   :  { %s16_s13 = sshll.u32 %s725_s12, 4  ;;  %s17_s13 = int_to_ptr.vmem [resolvable:$true] %s16_s13 }
   0x2   :  { %s711_s14 = scalar_lea.vmem %s17_s13, 4096  ;;  %p716_p1 = scmp.lt.s32.totalorder %s17_s13, %s17_s13 }
   0x3   :  { %p712_p0 = scmp.ne.s32.totalorder %s17_s13, %s711_s14  ;;  %p717_p2 = scmp.lt.s32.totalorder %s711_s14, %s711_s14 }
   0x5   :  { %p718_p3 = por %p717_p2, %p716_p1 }
   0x7   :  { %p719_p4 = pnand %p718_p3, %p712_p0 }
   0x9   :  { %722 = shalt.err (!%p719_p4)
}
   0xa   :  { %s726_s15 = smov 64   ;;  %s727_s16 = smov 4  }
   0xb   :  { %22 = dma.hbm_to_vmem [thread:$0]  %s815_s1, 4096, %s17_s13, [#allocation3], %s726_s15, %s726_s15, %s727_s16  }
   0xc   :  { %723 = dma.done.wait [#allocation3], 4096  }
   0xd   :  { %724 = vsyncadd [#allocation3], 4294963200  ;;  %v728_v0 = vmov 0.0   ;;  %vm729_vm0 = vmmov 0   ;;  %v670_v1 = vld [vmem:[#allocation2 + $0x38] sm:$0xff]   ;;  %v671_v2 = vld [vmem:[#allocation2 + $0x30] sm:$0xff]  }
   0xe   :  { %585 = vmatprep.subr.bf16.mxu0 %v728_v0  ;;  %601 = vmatprep.mubr.msk.bf16.mxu0 %vm729_vm0, %v728_v0  ;;  %v672_v3 = vld [vmem:[#allocation2 + $0x28] sm:$0xff]   ;;  %v679_v4 = vld [vmem:[#allocation2 + $0x78] sm:$0xff]   ;;  %v673_v5 = vld [vmem:[#allocation2 + $0x20] sm:$0xff]  }
   0xf   :  { %605 = vmatprep.subr.bf16.mxu1 %v728_v0  ;;  %621 = vmatprep.mubr.msk.bf16.mxu1 %vm729_vm0, %v728_v0  ;;  %v680_v6 = vld [vmem:[#allocation2 + $0x70] sm:$0xff]   ;;  %v674_v7 = vld [vmem:[#allocation2 + $0x18] sm:$0xff]   ;;  %v681_v8 = vld [vmem:[#allocation2 + $0x68] sm:$0xff]  }
  0x10   :  { %586 = vmatpush3.bf16.msra.mxu0 %v670_v1  ;;  %606 = vmatpush3.bf16.msra.mxu1 %v679_v4  ;;  %v675_v9 = vld [vmem:[#allocation2 + $0x10] sm:$0xff]   ;;  %v682_v10 = vld [vmem:[#allocation2 + $0x60] sm:$0xff]   ;;  %v676_v11 = vld [vmem:[#allocation2 + $0x8] sm:$0xff]  }
  0x11   :  { %587 = vmatprep.subr.bf16.mxu0 %v728_v0  ;;  %607 = vmatprep.subr.bf16.mxu1 %v728_v0  ;;  %v683_v12 = vld [vmem:[#allocation2 + $0x58] sm:$0xff]   ;;  %v677_v13 = vld [vmem:[#allocation2] sm:$0xff]   ;;  %v684_v15 = vld [vmem:[#allocation2 + $0x50] sm:$0xff]  }
  0x12   :  { %v678_v14 = vld [vmem:[%s814_s0] sm:$0xff]   ;;  %v685_v16 = vld [vmem:[#allocation2 + $0x48] sm:$0xff]   ;;  %v687_v18 = vld [vmem:[#allocation2 + $0xb8] sm:$0xff]  }
  0x13   :  { %v686_v17 = vld [vmem:[#allocation2 + $0x40] sm:$0xff]   ;;  %v688_v19 = vld [vmem:[#allocation2 + $0xb0] sm:$0xff]   ;;  %v689_v20 = vld [vmem:[#allocation2 + $0xa8] sm:$0xff]  }
  0x14   :  { %588 = vmatpush3.bf16.msra.mxu0 %v671_v2  ;;  %608 = vmatpush3.bf16.msra.mxu1 %v680_v6  ;;  %v690_v21 = vld [vmem:[#allocation2 + $0xa0] sm:$0xff]   ;;  %v691_v22 = vld [vmem:[#allocation2 + $0x98] sm:$0xff]   ;;  %v692_v33 = vld [vmem:[#allocation2 + $0x90] sm:$0xff]  }
  0x15   :  { %589 = vmatprep.subr.bf16.mxu0 %v728_v0  ;;  %609 = vmatprep.subr.bf16.mxu1 %v728_v0  ;;  %v509_v23 = vld [vmem:[%s816_s2] ss:$0 sm:$0xff]  ;;  %v693_v34 = vld [vmem:[#allocation2 + $0x88] sm:$0xff]   ;;  %v695_v36 = vld [vmem:[#allocation2 + $0xf8] sm:$0xff]  }
  0x16   :  { %v694_v35 = vld [vmem:[#allocation2 + $0x80] sm:$0xff]   ;;  %v696_v37 = vld [vmem:[#allocation2 + $0xf0] sm:$0xff]   ;;  %v697_v38 = vld [vmem:[#allocation2 + $0xe8] sm:$0xff]  }
  0x17   :  { %v698_v39 = vld [vmem:[#allocation2 + $0xe0] sm:$0xff]   ;;  %v699_v40 = vld [vmem:[#allocation2 + $0xd8] sm:$0xff]   ;;  %v700_v51 = vld [vmem:[#allocation2 + $0xd0] sm:$0xff]  }
  0x18   :  { %590 = vmatpush3.bf16.msra.mxu0 %v672_v3  ;;  %610 = vmatpush3.bf16.msra.mxu1 %v681_v8  ;;  %v520_v41 = vld [vmem:[%s816_s2 + $0x1] ss:$0 sm:$0xff]  ;;  %v701_v52 = vld [vmem:[#allocation2 + $0xc8] sm:$0xff]   ;;  %v530_v54 = vld [vmem:[%s816_s2 + $0x2] ss:$0 sm:$0xff] }
  0x19   :  { %591 = vmatprep.subr.bf16.mxu0 %v728_v0  ;;  %611 = vmatprep.subr.bf16.mxu1 %v728_v0  ;;  %v702_v53 = vld [vmem:[#allocation2 + $0xc0] sm:$0xff]  }
  0x1c   :  { %592 = vmatpush3.bf16.msra.mxu0 %v673_v5  ;;  %612 = vmatpush3.bf16.msra.mxu1 %v682_v10 }
  0x1d   :  { %593 = vmatprep.subr.bf16.mxu0 %v728_v0  ;;  %613 = vmatprep.subr.bf16.mxu1 %v728_v0 }
  0x20   :  { %594 = vmatpush3.bf16.msra.mxu0 %v674_v7  ;;  %614 = vmatpush3.bf16.msra.mxu1 %v683_v12 }
  0x21   :  { %595 = vmatprep.subr.bf16.mxu0 %v728_v0  ;;  %615 = vmatprep.subr.bf16.mxu1 %v728_v0 }
  0x24   :  { %596 = vmatpush3.bf16.msra.mxu0 %v675_v9  ;;  %616 = vmatpush3.bf16.msra.mxu1 %v684_v15 }
  0x25   :  { %597 = vmatprep.subr.bf16.mxu0 %v728_v0  ;;  %617 = vmatprep.subr.bf16.mxu1 %v728_v0 }
  0x28   :  { %598 = vmatpush3.bf16.msra.mxu0 %v676_v11  ;;  %618 = vmatpush3.bf16.msra.mxu1 %v685_v16 }
  0x29   :  { %599 = vmatprep.subr.bf16.mxu0 %v728_v0  ;;  %619 = vmatprep.subr.bf16.mxu1 %v728_v0 }
  0x2c   :  { %600 = vmatpush3.bf16.msra.mxu0 %v677_v13  ;;  %620 = vmatpush3.bf16.msra.mxu1 %v686_v17 }
  0x2d   :  { %625 = vmatprep.subr.bf16.mxu0 %v728_v0  ;;  %645 = vmatprep.subr.bf16.mxu1 %v728_v0 }
  0x2f   :  { %602 = vmatmul.mubr.bf16.vlgmr.msra.gmra.mxu0 %v678_v14 }
  0x30   :  { %641 = vmatprep.mubr.msk.bf16.mxu0 %vm729_vm0, %v728_v0  ;;  %626 = vmatpush3.bf16.msra.mxu0 %v687_v18 }
  0x31   :  { %627 = vmatprep.subr.bf16.mxu0 %v728_v0 }
  0x34   :  { %628 = vmatpush3.bf16.msra.mxu0 %v688_v19 }
  0x35   :  { %629 = vmatprep.subr.bf16.mxu0 %v728_v0 }
  0x38   :  { %630 = vmatpush3.bf16.msra.mxu0 %v689_v20 }
  0x39   :  { %631 = vmatprep.subr.bf16.mxu0 %v728_v0 }
  0x3c   :  { %632 = vmatpush3.bf16.msra.mxu0 %v690_v21 }
  0x3d   :  { %633 = vmatprep.subr.bf16.mxu0 %v728_v0 }
  0x40   :  { %634 = vmatpush3.bf16.msra.mxu0 %v691_v22 }
  0x41   :  { %635 = vmatprep.subr.bf16.mxu0 %v728_v0 }
  0x44   :  { %636 = vmatpush3.bf16.msra.mxu0 %v692_v33 }
  0x45   :  { %637 = vmatprep.subr.bf16.mxu0 %v728_v0 }
  0x48   :  { %638 = vmatpush3.bf16.msra.mxu0 %v693_v34 }
  0x49   :  { %639 = vmatprep.subr.bf16.mxu0 %v728_v0 }
  0x4c   :  { %640 = vmatpush3.bf16.msra.mxu0 %v694_v35 }
  0xef   :  { %v142_v24 = vpop.f32.mrf.mxu0 }
  0xf0   :  { %v143_v26 = vadd.f32 %v509_v23, %v142_v24 }
  0xf1   :  { %v603_v25 = vpop.f32.mrf.mxu0 }
  0xf2   :  { %v149_v30 = vmax.f32 %v143_v26, 0.0 }
  0xf3   :  { %v145_v27 = vpop.f32.mrf.mxu0 }
  0xf4   :  { %v146_v28 = vadd.f32 %v509_v23, %v145_v27 }
  0xf5   :  { %v604_v29 = vpop.f32.mrf.mxu0 }
  0xf6   :  { %v150_v31 = vmax.f32 %v146_v28, 0.0 }
  0xf8   :  { %v151_v32 = vpack.c.bf16 %v150_v31, %v149_v30 }
  0xfa   :  { %622 = vmatmul.mubr.bf16.vlgmr.msra.gmra.mxu1 %v151_v32 }
  0xfb   :  { %661 = vmatprep.mubr.msk.bf16.mxu1 %vm729_vm0, %v728_v0  ;;  %646 = vmatpush3.bf16.msra.mxu1 %v695_v36 }
  0xfc   :  { %647 = vmatprep.subr.bf16.mxu1 %v728_v0 }
  0xff   :  { %648 = vmatpush3.bf16.msra.mxu1 %v696_v37 }
 0x100   :  { %649 = vmatprep.subr.bf16.mxu1 %v728_v0 }
 0x103   :  { %650 = vmatpush3.bf16.msra.mxu1 %v697_v38 }
 0x104   :  { %651 = vmatprep.subr.bf16.mxu1 %v728_v0 }
 0x107   :  { %652 = vmatpush3.bf16.msra.mxu1 %v698_v39 }
 0x108   :  { %653 = vmatprep.subr.bf16.mxu1 %v728_v0 }
 0x10b   :  { %654 = vmatpush3.bf16.msra.mxu1 %v699_v40 }
 0x10c   :  { %655 = vmatprep.subr.bf16.mxu1 %v728_v0 }
 0x10f   :  { %656 = vmatpush3.bf16.msra.mxu1 %v700_v51 }
 0x110   :  { %657 = vmatprep.subr.bf16.mxu1 %v728_v0 }
 0x113   :  { %658 = vmatpush3.bf16.msra.mxu1 %v701_v52 }
 0x114   :  { %659 = vmatprep.subr.bf16.mxu1 %v728_v0  ;;  %v540_v0 = vld [vmem:[%s816_s2 + $0x3] ss:$0 sm:$0xff] }
 0x117   :  { %660 = vmatpush3.bf16.msra.mxu1 %v702_v53 }
 0x1ba   :  { %v259_v42 = vpop.f32.mrf.mxu1 }
 0x1bb   :  { %v260_v44 = vadd.f32 %v520_v41, %v259_v42 }
 0x1bc   :  { %v623_v43 = vpop.f32.mrf.mxu1 }
 0x1bd   :  { %v266_v48 = vmax.f32 %v260_v44, 0.0 }
 0x1be   :  { %v262_v45 = vpop.f32.mrf.mxu1 }
 0x1bf   :  { %v263_v46 = vadd.f32 %v520_v41, %v262_v45 }
 0x1c0   :  { %v624_v47 = vpop.f32.mrf.mxu1 }
 0x1c1   :  { %v267_v49 = vmax.f32 %v263_v46, 0.0 }
 0x1c3   :  { %v268_v50 = vpack.c.bf16 %v267_v49, %v266_v48 }
 0x1c5   :  { %642 = vmatmul.mubr.bf16.vlgmr.msra.gmra.mxu0 %v268_v50 }
 0x285   :  { %v376_v55 = vpop.f32.mrf.mxu0 }
 0x286   :  { %v377_v57 = vadd.f32 %v530_v54, %v376_v55 }
 0x287   :  { %v643_v56 = vpop.f32.mrf.mxu0 }
 0x288   :  { %v383_v61 = vmax.f32 %v377_v57, 0.0 }
 0x289   :  { %v379_v58 = vpop.f32.mrf.mxu0 }
 0x28a   :  { %v380_v59 = vadd.f32 %v530_v54, %v379_v58 }
 0x28b   :  { %v644_v60 = vpop.f32.mrf.mxu0 }
 0x28c   :  { %v384_v62 = vmax.f32 %v380_v59, 0.0 }
 0x28e   :  { %v385_v63 = vpack.c.bf16 %v384_v62, %v383_v61 }
 0x290   :  { %662 = vmatmul.mubr.bf16.vlgmr.msra.gmra.mxu1 %v385_v63 }
 0x350   :  { %v493_v1 = vpop.f32.mrf.mxu1 }
 0x351   :  { %v494_v2 = vadd.f32 %v540_v0, %v493_v1 }
 0x352   :  { %v663_v3 = vpop.f32.mrf.mxu1 }
 0x353   :  { %v500_v4 = vmax.f32 %v494_v2, 0.0 }
 0x354   :  { %v496_v5 = vpop.f32.mrf.mxu1 }
 0x355   :  { %502 = vst [vmem:[%s817_s3] sm:$0xff] %v500_v4  ;;  %v497_v6 = vadd.f32 %v540_v0, %v496_v5 }
 0x356   :  { %v664_v7 = vpop.f32.mrf.mxu1 }
 0x357   :  { %v501_v8 = vmax.f32 %v497_v6, 0.0 }
 0x359   :  { %503 = vst [vmem:[%s817_s3 + $0x8] sm:$0xff] %v501_v8 }
 0x35a   :  { %508 = vsyncpa [#allocation3], 1 }

</bundles_post_ra>
